<compile_context>
chip_gen: v5e
topology: v5e:2x2
jax: 0.10.0
libtpu: 0.0.40
codegen_flags: <defaults>
</compile_context>

<pallas_src>
import math

import jax
import jax.numpy as jnp
from jax.experimental import pallas as pl
from jax.experimental.pallas import tpu as pltpu


# ----------------------------------------------------------------------------
# small helpers
# ----------------------------------------------------------------------------
def _cdiv(a, b):
    return -(-a // b)


def _round_up(x, m):
    return _cdiv(x, m) * m


def _balanced_tile(dim, max_tile, granule):
    """Pad `dim` to `granule`, then pick a tile (multiple of `granule`,
    ~<= max_tile) that divides the padded dim with minimal over-padding."""
    padded = _round_up(dim, granule)
    if padded <= max_tile:
        return padded, padded
    n = _cdiv(padded, max_tile)
    tile = _round_up(_cdiv(padded, n), granule)
    return tile, tile * n


def _vmem_budget_bytes():
    """Per-generation VMEM budget: ~3/4 of physical, capped at 96 MiB.
    v7x (64 MiB) -> 48 MiB; v5e/v6e (128 MiB) -> 96 MiB; 48 MiB fallback is
    safe on every generation."""
    try:
        cap = getattr(pltpu.get_tpu_info(), "vmem_capacity_bytes", None)
        if cap:
            return min(int(cap) * 3 // 4, 96 * 1024 * 1024)
    except Exception:
        pass
    return 48 * 1024 * 1024


def _prep(arr, pads, dtype):
    """Cast + zero-pad, skipping whichever is a no-op (XLA fuses the convert
    into the pad, so this is at most one extra HBM pass per operand)."""
    if arr.dtype != dtype:
        arr = arr.astype(dtype)
    if any(p for _, p in pads):
        arr = jnp.pad(arr, pads)
    return arr


# ----------------------------------------------------------------------------
# kernels
# ----------------------------------------------------------------------------
def _gconv_kernel(x_ref, w_ref, adj_ref, b_ref, o_ref):
    """Collapsed node reduction: out = adj_tile @ (x[b] @ W[:, j]) + bias."""
    s = jnp.dot(x_ref[...], w_ref[...],
                preferred_element_type=jnp.float32).astype(adj_ref.dtype)
    acc = jnp.dot(adj_ref[...], s, preferred_element_type=jnp.float32)
    o_ref[...] = (acc + b_ref[...]).astype(o_ref.dtype)


def _gconv_reduce_f32_kernel(x_ref, w_ref, adj_ref, b_ref, o_ref):
    """Node-axis tiled variant, f32 output: accumulate directly into the
    resident output block (no scratch; bias is the k==0 init)."""
    k = pl.program_id(3)

    @pl.when(k == 0)
    def _():
        o_ref[...] = jnp.broadcast_to(b_ref[...], o_ref.shape)

    s = jnp.dot(x_ref[...], w_ref[...],
                preferred_element_type=jnp.float32).astype(adj_ref.dtype)
    o_ref[...] += jnp.dot(adj_ref[...], s, preferred_element_type=jnp.float32)


def _gconv_reduce_kernel(x_ref, w_ref, adj_ref, b_ref, o_ref, acc_ref):
    """Node-axis tiled variant with a f32 VMEM accumulator (any out dtype)."""
    k = pl.program_id(3)

    @pl.when(k == 0)
    def _():
        acc_ref[...] = jnp.zeros_like(acc_ref)

    s = jnp.dot(x_ref[...], w_ref[...],
                preferred_element_type=jnp.float32).astype(adj_ref.dtype)
    acc_ref[...] += jnp.dot(adj_ref[...], s, preferred_element_type=jnp.float32)

    @pl.when(k == pl.num_programs(3) - 1)
    def _():
        o_ref[...] = (acc_ref[...] + b_ref[...]).astype(o_ref.dtype)


# ----------------------------------------------------------------------------
# wrapper
# ----------------------------------------------------------------------------
def gconv(x, weight, adj, bias=None, *, compute_dtype=None,
          block_m=512, block_n=512, block_k=1024):
    """x: (B, N, F_in), weight: (F_in, F_out), adj: (M, N), bias: (F_out,)|None.

    Returns (B, M, F_out) = adj @ (x @ weight) + bias per batch element.
    compute_dtype defaults to bf16 (f32 accumulation); pass jnp.float32 for
    bit-tight parity with a f32 reference."""
    B, N, F_in = x.shape
    F_in_w, F_out = weight.shape
    assert F_in_w == F_in
    M, N_adj = adj.shape
    assert N_adj == N
    assert block_m % 8 == 0 and block_n % 128 == 0 and block_k % 128 == 0

    out_dtype = x.dtype
    cd = jnp.bfloat16 if compute_dtype is None else compute_dtype
    c_item = jnp.dtype(cd).itemsize
    o_item = jnp.dtype(out_dtype).itemsize
    gm = 8 if c_item >= 4 else 16            # sublane granule for the row axis
    budget = _vmem_budget_bytes()

    # ---- tile selection: start at the targets, shrink until the pipelined ---
    # ---- working set fits the per-generation VMEM budget --------------------
    bm_t, bn_t, bk_t = block_m, block_n, block_k
    while True:
        tm, Mp = _balanced_tile(M, bm_t, gm)
        tk, Np = _balanced_tile(N, bk_t, 128)
        Fp128 = _round_up(F_out, 128)
        if Fp128 <= max(bn_t, 1024):          # one full-width lane tile
            bn, Fp = Fp128, Fp128
        else:
            bn, Fp = _balanced_tile(F_out, bn_t, 128)
        footprint = (2 * (tk * F_in * c_item        # x block (double-buffered)
                          + F_in * bn * c_item      # weight block
                          + tm * tk * c_item        # adj block
                          + bn * 4                  # bias block
                          + tm * bn * o_item)       # output block
                     + tk * bn * (4 + c_item)       # in-kernel support temp
                     + tm * bn * 4)                 # worst-case f32 accumulator
        if footprint <= budget or (bm_t <= 128 and bn_t <= 128 and bk_t <= 128):
            break
        bm_t = max(128, bm_t // 2)
        bn_t = max(128, bn_t // 2)
        bk_t = max(128, bk_t // 2)
    # TODO(synk): extremely wide F_in (tens of thousands) would also need an
    # F_in reduction axis (un-fused support GEMM); not needed for GConv sizes.

    n_i, n_j, n_k = Mp // tm, Fp // bn, Np // tk

    # ---- cast + zero-pad operands (skipped when already aligned) ------------
    x_p = _prep(x, ((0, 0), (0, Np - N), (0, 0)), cd)
    w_p = _prep(weight, ((0, 0), (0, Fp - F_out)), cd)
    adj_p = _prep(adj, ((0, Mp - M), (0, Np - N)), cd)
    if bias is None:
        bias_p = jnp.zeros((1, Fp), dtype=jnp.float32)
    else:
        bias_p = _prep(bias, ((0, Fp - F_out),), jnp.float32).reshape(1, Fp)

    flops = 2 * B * Mp * Np * Fp + 2 * n_i * B * Np * F_in * Fp
    bytes_accessed = ((B * Np * F_in + F_in * Fp + Mp * Np) * c_item
                      + B * Mp * Fp * o_item + Fp * 4)
    cost = pl.CostEstimate(flops=flops, transcendentals=0,
                           bytes_accessed=bytes_accessed)
    out_shape = jax.ShapeDtypeStruct((B, Mp, Fp), out_dtype)

    def cparams(sem):
        # all non-reduction axes "parallel" -> megacore / 2-TC sharding on v7x
        return pltpu.CompilerParams(dimension_semantics=sem,
                                    vmem_limit_bytes=budget)

    if n_k == 1:
        # Collapsed node reduction: no accumulator / pl.when.  Row-tile axis is
        # outermost so the adj tile (index map ignores b and j) is fetched once
        # per row tile and reused across all batch / feature-column steps.
        out_p = pl.pallas_call(
            _gconv_kernel,
            out_shape=out_shape,
            grid_spec=pltpu.PrefetchScalarGridSpec(
                num_scalar_prefetch=0,
                grid=(n_i, B, n_j),
                in_specs=[
                    pl.BlockSpec((None, Np, F_in), lambda i, b, j: (b, 0, 0)),
                    pl.BlockSpec((F_in, bn), lambda i, b, j: (0, j)),
                    pl.BlockSpec((tm, Np), lambda i, b, j: (i, 0)),
                    pl.BlockSpec((1, bn), lambda i, b, j: (0, j)),
                ],
                out_specs=pl.BlockSpec((None, tm, bn),
                                       lambda i, b, j: (b, i, j)),
            ),
            compiler_params=cparams(("parallel", "parallel", "parallel")),
            cost_estimate=cost,
        )(x_p, w_p, adj_p, bias_p)
    else:
        kernel = (_gconv_reduce_f32_kernel if out_dtype == jnp.float32
                  else _gconv_reduce_kernel)
        scratch = ([] if out_dtype == jnp.float32
                   else [pltpu.VMEM((tm, bn), jnp.float32)])
        out_p = pl.pallas_call(
            kernel,
            out_shape=out_shape,
            grid_spec=pltpu.PrefetchScalarGridSpec(
                num_scalar_prefetch=0,
                grid=(n_i, B, n_j, n_k),
                in_specs=[
                    pl.BlockSpec((None, tk, F_in), lambda i, b, j, k: (b, k, 0)),
                    pl.BlockSpec((F_in, bn), lambda i, b, j, k: (0, j)),
                    pl.BlockSpec((tm, tk), lambda i, b, j, k: (i, k)),
                    pl.BlockSpec((1, bn), lambda i, b, j, k: (0, j)),
                ],
                out_specs=pl.BlockSpec((None, tm, bn),
                                       lambda i, b, j, k: (b, i, j)),
                scratch_shapes=scratch,
            ),
            compiler_params=cparams(
                ("parallel", "parallel", "parallel", "arbitrary")),
            cost_estimate=cost,
        )(x_p, w_p, adj_p, bias_p)

    if Mp == M and Fp == F_out:
        return out_p
    return out_p[:, :M, :F_out]


# ----------------------------------------------------------------------------
# self-test
# ----------------------------------------------------------------------------
if __name__ == "__main__":
    key = jax.random.PRNGKey(0)
    keys = jax.random.split(key, 12)

    def ref_gconv(x, w, adj, b):
        s = jnp.einsum("mik,kj->mij", x.astype(jnp.float32), w)
        return jnp.einsum("ki,mij->mkj", adj, s) + b

    def check(out, ref, tol_rel):
        assert out.shape == ref.shape, (out.shape, ref.shape)
        err = float(jnp.max(jnp.abs(out.astype(jnp.float32) - ref)))
        scale = float(jnp.max(jnp.abs(ref)))
        assert err <= tol_rel * scale + 1e-4, (err, scale)

    def make_inputs(ks, B, N, F_in, F_out):
        stdv = 1.0 / math.sqrt(F_out)
        x = jax.random.normal(ks[0], (B, N, F_in), dtype=jnp.float32)
        adj = jax.random.uniform(ks[1], (N, N), dtype=jnp.float32)
        w = jax.random.uniform(ks[2], (F_in, F_out), jnp.float32, -stdv, stdv)
        b = jax.random.uniform(ks[3], (F_out,), jnp.float32, -stdv, stdv)
        return x, adj, w, b

    # --- case 1/2: module-sized shapes, fused (collapsed-reduction) path -----
    x, adj, w, b = make_inputs(keys[0:4], B=2, N=16, F_in=32, F_out=32)
    ref = ref_gconv(x, w, adj, b)
    out = gconv(x, w, adj, b, compute_dtype=jnp.float32)   # exact-parity path
    jax.block_until_ready(out)
    check(out, ref, 1e-4)
    out = gconv(x, w, adj, b)                               # default bf16 compute
    jax.block_until_ready(out)
    check(out, ref, 3e-2)

    # --- case 3: unaligned shapes exercise the padding logic ------------------
    x, adj, w, b = make_inputs(keys[4:8], B=3, N=20, F_in=24, F_out=40)
    ref = ref_gconv(x, w, adj, b)
    out = gconv(x, w, adj, b, compute_dtype=jnp.float32)
    jax.block_until_ready(out)
    check(out, ref, 1e-4)

    # --- case 4/5: node reduction tiled over the grid (force small block_k) ---
    x, adj, w, b = make_inputs(keys[8:12], B=2, N=300, F_in=24, F_out=40)
    ref = ref_gconv(x, w, adj, b)
    out = gconv(x, w, adj, b, compute_dtype=jnp.float32, block_k=128)
    jax.block_until_ready(out)
    check(out, ref, 1e-4)                                   # f32-direct accumulate
    x_bf = x.astype(jnp.bfloat16)
    ref_bf = ref_gconv(x_bf, w, adj, b)
    out = gconv(x_bf, w, adj, b, block_k=128)               # scratch-acc variant
    jax.block_until_ready(out)
    check(out, ref_bf, 3e-2)

    print("KERNEL_OK")
</pallas_src>

<mosaic_0001>
module attributes {stable_mosaic.version = 11 : i64} {
  func.func @_gconv_kernel(%arg0: i32, %arg1: i32, %arg2: i32, %arg3: memref<1x128x32xf32, #tpu.memory_space<vmem>>, %arg4: memref<32x128xf32, #tpu.memory_space<vmem>>, %arg5: memref<16x128xf32, #tpu.memory_space<vmem>>, %arg6: memref<1x128xf32, #tpu.memory_space<vmem>>, %arg7: memref<1x16x128xf32, #tpu.memory_space<vmem>>) attributes {dimension_semantics = [#tpu.dimension_semantics<parallel>, #tpu.dimension_semantics<parallel>, #tpu.dimension_semantics<parallel>], iteration_bounds = array<i64: 1, 2, 1>, scalar_prefetch = 0 : i64, scratch_operands = 0 : i64, tpu.core_type = #tpu.core_type<tc>, window_params = [{transform_indices = @transform_0, window_bounds = array<i64: 1, 128, 32>}, {transform_indices = @transform_1, window_bounds = array<i64: 32, 128>}, {transform_indices = @transform_2, window_bounds = array<i64: 16, 128>}, {transform_indices = @transform_3, window_bounds = array<i64: 1, 128>}, {transform_indices = @transform_4, window_bounds = array<i64: 1, 16, 128>}]} {
    %c0 = arith.constant 0 : index
    %c0_0 = arith.constant 0 : index
    %c0_1 = arith.constant 0 : index
    %0 = vector.load %arg3[%c0, %c0_0, %c0_1] : memref<1x128x32xf32, #tpu.memory_space<vmem>>, vector<1x128x32xf32>
    %1 = vector.shape_cast %0 : vector<1x128x32xf32> to vector<128x32xf32>
    %c0_2 = arith.constant 0 : index
    %c0_3 = arith.constant 0 : index
    %2 = vector.load %arg4[%c0_2, %c0_3] : memref<32x128xf32, #tpu.memory_space<vmem>>, vector<32x128xf32>
    %cst = arith.constant dense<0.000000e+00> : vector<128x128xf32>
    %3 = tpu.matmul %1, %2, %cst {dimension_numbers = #tpu.dot_dimension_numbers<[1], [0], [0], [1], [0, 0, 1, 1], [], []>} : vector<128x32xf32>, vector<32x128xf32>, vector<128x128xf32> -> vector<128x128xf32>
    %c0_4 = arith.constant 0 : index
    %c0_5 = arith.constant 0 : index
    %4 = vector.load %arg5[%c0_4, %c0_5] : memref<16x128xf32, #tpu.memory_space<vmem>>, vector<16x128xf32>
    %cst_6 = arith.constant dense<0.000000e+00> : vector<16x128xf32>
    %5 = tpu.matmul %4, %3, %cst_6 {dimension_numbers = #tpu.dot_dimension_numbers<[1], [0], [0], [1], [0, 0, 1, 1], [], []>} : vector<16x128xf32>, vector<128x128xf32>, vector<16x128xf32> -> vector<16x128xf32>
    %c0_7 = arith.constant 0 : index
    %c0_8 = arith.constant 0 : index
    %6 = vector.load %arg6[%c0_7, %c0_8] : memref<1x128xf32, #tpu.memory_space<vmem>>, vector<1x128xf32>
    %7 = vector.broadcast %6 : vector<1x128xf32> to vector<16x128xf32>
    %8 = arith.addf %5, %7 : vector<16x128xf32>
    %c0_9 = arith.constant 0 : index
    %c0_10 = arith.constant 0 : index
    %c0_11 = arith.constant 0 : index
    %9 = vector.load %arg7[%c0_9, %c0_10, %c0_11] : memref<1x16x128xf32, #tpu.memory_space<vmem>>, vector<1x16x128xf32>
    %10 = vector.shape_cast %9 : vector<1x16x128xf32> to vector<16x128xf32>
    %11 = vector.shape_cast %8 : vector<16x128xf32> to vector<1x16x128xf32>
    tpu.vector_store %arg7[%c0_9, %c0_10, %c0_11], %11 {strides = array<i32>} : memref<1x16x128xf32, #tpu.memory_space<vmem>>, vector<1x16x128xf32>,
    return
  }
  func.func @transform_0(%arg0: i32, %arg1: i32, %arg2: i32) -> (i32, i32, i32) {
    %c0_i32 = arith.constant 0 : i32
    %c0_i32_0 = arith.constant 0 : i32
    %c0_i32_1 = arith.constant 0 : i32
    return %arg1, %c0_i32, %c0_i32_0 : i32, i32, i32
  }
  func.func @transform_1(%arg0: i32, %arg1: i32, %arg2: i32) -> (i32, i32) {
    %c0_i32 = arith.constant 0 : i32
    %c0_i32_0 = arith.constant 0 : i32
    return %c0_i32, %arg2 : i32, i32
  }
  func.func @transform_2(%arg0: i32, %arg1: i32, %arg2: i32) -> (i32, i32) {
    %c0_i32 = arith.constant 0 : i32
    %c0_i32_0 = arith.constant 0 : i32
    return %arg0, %c0_i32 : i32, i32
  }
  func.func @transform_3(%arg0: i32, %arg1: i32, %arg2: i32) -> (i32, i32) {
    %c0_i32 = arith.constant 0 : i32
    %c0_i32_0 = arith.constant 0 : i32
    return %c0_i32, %arg2 : i32, i32
  }
  func.func @transform_4(%arg0: i32, %arg1: i32, %arg2: i32) -> (i32, i32, i32) {
    %c0_i32 = arith.constant 0 : i32
    return %arg1, %arg0, %arg2 : i32, i32, i32
  }
}

</mosaic_0001>

<bundles_post_ra>
// kernel: tpu_custom_call.1
= control target key start
LH: loop header
LB: loop body
LE: loop exit
PB: predicated region body
PF: predicated region fallthrough
CT: control target
= control target key end

     0   :  { %9 = vsyncpa [#allocation3], 0  ;;  %s935_s0 = inlined_call_operand.vmem [shape: f32[2,128,32], index: 0, kind: input, shape index: {}]   ;;  %s936_s1 = inlined_call_operand.vmem [shape: f32[32,128], index: 1, kind: input, shape index: {}]   ;;  %s937_s2 = inlined_call_operand.vmem [shape: f32[16,128], index: 2, kind: input, shape index: {}]   ;;  %s938_s3 = inlined_call_operand.vmem [shape: f32[1,128], index: 3, kind: input, shape index: {}]   ;;  %s939_s4 = inlined_call_operand.hbm [shape: f32[2,16,128], index: 4, kind: output, shape index: {}]  }
   0x1   :  { %11 = vsyncpa [#allocation3 + $0x1], 0  ;;  %s783_s15 = smov 0   ;;  %s785_s16 = smov 0  }
   0x2   :  { %s787_s17 = smov 0   ;;  %s789_s18 = smov 0  }
   0x3   :  { %s791_s19 = smov 0   ;;  %s793_s20 = smov 0  }
   0x4 LB: > { %s576_s21 = sadd.s32 4294967295, %s754_s20   ;;  %s577_s22 = sadd.s32 4294967294, %s754_s20   ;;  %s754_s20 = sphi %s793_s20, %s17_s20   ;;  %s750_s19 = sphi %s791_s19, %s946_s19   ;;  %s746_s18 = sphi %s789_s18, %s945_s18   ;;  %s742_s17 = sphi %s787_s17, %s944_s17   ;;  %s738_s16 = sphi %s785_s16, %s943_s16   ;;  %s734_s15 = sphi %s783_s15, %s942_s15  }
   0x5   : > { %s32_s23 = sadd.s32 1, %s750_s19  ;;  %s151_s24 = sadd.s32 1, %s742_s17 }
   0x6   : > { %p34_p0 = scmp.ge.s32.totalorder %s32_s23, 2  ;;  %p161_p1 = scmp.ne.s32.totalorder %s742_s17, %s738_s16 }
   0x7   : > { %p162_p2 = scmp.eq.s32.totalorder %s576_s21, 1  ;;  %p167_p3 = scmp.ne.s32.totalorder %s738_s16, %s734_s15 }
   0x8   : > { %s948_s23 = smov (%p34_p0, %s32_s23), 0  ;;  %p168_p5 = scmp.eq.s32.totalorder %s577_s22, 1 }
   0x9   : > { %p823_p4 = por %p162_p2, %p161_p1  ;;  %s144_s26 = ssub.s32 %s750_s19, %s948_s23 }
   0xa   : > { %p583_p6 = scmp.ge.s32.totalorder %s754_s20, 1  ;;  %p149_p7 = scmp.eq.s32.totalorder %s144_s26, 0 }
   0xb   : > { %p830_p8 = por %p168_p5, %p167_p3  ;;  %p216_p9 = scmp.lt.s32.totalorder %s754_s20, 3 }
   0xc   : > { %s836_s28 = scalar_select %p149_p7, %s742_s17, %s151_s24  }
   0xd   : > { %p217_p10 = pnand %p583_p6, %p216_p9 }
   0xe   : > { %p254_p11 = scmp.lt.s32.totalorder (!%p217_p10), %s746_s18, 1  ;;  %s251_s30 = sand.u32 (!%p217_p10), 1, %s738_s16  }
   0xf   : > { %220 = sbr.rel (%p217_p10) target bundleno = 363 (0x16b), region = 36  ;;  %s584_s5 = sshll.u32 (!%p217_p10), %s251_s30, 4 }
  0x10   : > { %s609_s8 = sshll.u32 (!%p217_p10), %s746_s18, 4  ;;  %s696_s29 = scalar_lea.hbm (!%p217_p10), %s939_s4, 32 }
  0x11   : > { %s453_s11 = scalar_lea.hbm (!%p217_p10), %s939_s4, %s609_s8 }
  0x12   : > { %s456_s14 = sshll.u32 (!%p217_p10), %s453_s11, 4  ;;  %s457_s14 = int_to_ptr.hbm [resolvable:$true] %s456_s14 }
  0x13   : > { %s690_s22 = sshra.s32 (!%p217_p10), %s457_s14, 4  ;;  %s691_s22 = int_to_ptr.hbm [resolvable:$true] %s690_s22 }
  0x14   : > { %v292_v0 = vld [vmem:[%s936_s1 + $0x18] sm:$0xff]  ;;  %v291_v1 = vld [vmem:[%s936_s1 + $0x10] sm:$0xff]  ;;  %v290_v2 = vld [vmem:[%s936_s1 + $0x8] sm:$0xff]  ;;  %s255_s9 = scalar_select %p254_p11, %s746_s18, 1  ;;  %vm293_vm0 = vcmask 261120  }
  0x15   : > { %611 = vmatpush.msra.mxu3 %v292_v0  ;;  %610 = vmatpush.msra.mxu2 %v292_v0  ;;  %v289_v3 = vld [vmem:[%s936_s1] sm:$0xff]  ;;  %v408_v37 = vld [vmem:[%s937_s2 + $0x8] sm:$0xff]  ;;  %s692_s18 = scalar_lea.hbm %s691_s22, 16  ;;  %p697_p1 = scmp.lt.s32.totalorder %s691_s22, %s939_s4 }
  0x16   : > { %354 = vmatpush.msra.mxu0 %v292_v0  ;;  %s608_s12 = sshll.u32 %s255_s9, 7  ;;  %v407_v36 = vld [vmem:[%s937_s2] sm:$0xff]  ;;  %p693_p12 = scmp.ne.s32.totalorder %s691_s22, %s692_s18 }
  0x17   : > { %613 = vmatpush.msra.mxu3 %v291_v1  ;;  %612 = vmatpush.msra.mxu2 %v291_v1  ;;  %s855_s21 = scalar_lea.vmem %s935_s0, %s608_s12  ;;  %v675_v38 = vld [vmem:[%s938_s3] ss:$0 sm:$0xff]  ;;  %s253_s12 = scalar_lea.vmem [#allocation2], %s584_s5 }
  0x18   : > { %355 = vmatpush.msra.mxu0 %v291_v1  ;;  %v284_v4 = vld [vmem:[%s855_s21 + $0x58] sm:$0xff]  ;;  %v278_v5 = vld [vmem:[%s855_s21 + $0x28] sm:$0xff]  ;;  %v273_v6 = vld [vmem:[%s855_s21] sm:$0xff]  ;;  %s454_s13 = sshll.u32 %s253_s12, 4  ;;  %p694_p13 = pnand %p693_p12, %p823_p4  ;;  %s455_s13 = int_to_ptr.vmem [resolvable:$true] %s454_s13 }
  0x19   : > { %615 = vmatpush.msra.mxu3 %v290_v2  ;;  %614 = vmatpush.msra.mxu2 %v290_v2  ;;  %v285_v7 = vld [vmem:[%s855_s21 + $0x60] sm:$0xff]  ;;  %v279_v8 = vld [vmem:[%s855_s21 + $0x30] sm:$0xff]  ;;  %v274_v9 = vld [vmem:[%s855_s21 + $0x8] sm:$0xff]  ;;  %p698_p2 = scmp.lt.s32.totalorder %s696_s29, %s692_s18 }
  0x1a   : > { %356 = vmatpush.msra.mxu0 %v290_v2  ;;  %v286_v10 = vld [vmem:[%s855_s21 + $0x68] sm:$0xff]  ;;  %v280_v11 = vld [vmem:[%s855_s21 + $0x38] sm:$0xff]  ;;  %v275_v12 = vld [vmem:[%s855_s21 + $0x10] sm:$0xff]  ;;  %p695_p0 = pneg %p694_p13 }
  0x1b   : > { %617 = vmatpush.msra.mxu3 %v289_v3  ;;  %616 = vmatpush.msra.mxu2 %v289_v3  ;;  %v287_v13 = vld [vmem:[%s855_s21 + $0x70] sm:$0xff]  ;;  %v281_v14 = vld [vmem:[%s855_s21 + $0x40] sm:$0xff]  ;;  %v276_v15 = vld [vmem:[%s855_s21 + $0x18] sm:$0xff]  ;;  %p699_p3 = por %p698_p2, %p697_p1 }
  0x1c   : > { %598 = vmatmul.msk.f32.vlgmr.msra.gmra.mxu3 %vm293_vm0, %v284_v4  ;;  %592 = vmatmul.msk.f32.vlgmr.msra.gmra.mxu2 %vm293_vm0, %v278_v5  ;;  %v288_v16 = vld [vmem:[%s855_s21 + $0x78] sm:$0xff]  ;;  %v282_v17 = vld [vmem:[%s855_s21 + $0x48] sm:$0xff]  ;;  %v277_v18 = vld [vmem:[%s855_s21 + $0x20] sm:$0xff] }
  0x1d   : > { %357 = vmatpush.msra.mxu0 %v289_v3  ;;  %v283_v19 = vld [vmem:[%s855_s21 + $0x50] sm:$0xff]  ;;  %s439_s21 = scalar_lea.sflag [#allocation3], %s251_s30  ;;  %p700_p5 = pnand %p699_p3, %p695_p0 }
  0x1e   : > { %587 = vmatmul.msk.f32.vlgmr.msra.gmra.mxu0 %vm293_vm0, %v273_v6 }
  0x24   : > { %599 = vmatmul.msk.f32.gmra.mxu3 %vm293_vm0, %v285_v7  ;;  %593 = vmatmul.msk.f32.gmra.mxu2 %vm293_vm0, %v279_v8 }
  0x26   : > { %588 = vmatmul.msk.f32.gmra.mxu0 %vm293_vm0, %v274_v9 }
  0x2c   : > { %600 = vmatmul.msk.f32.gmra.mxu3 %vm293_vm0, %v286_v10  ;;  %594 = vmatmul.msk.f32.gmra.mxu2 %vm293_vm0, %v280_v11 }
  0x2e   : > { %589 = vmatmul.msk.f32.gmra.mxu0 %vm293_vm0, %v275_v12 }
  0x34   : > { %601 = vmatmul.msk.f32.gmra.mxu3 %vm293_vm0, %v287_v13  ;;  %595 = vmatmul.msk.f32.gmra.mxu2 %vm293_vm0, %v281_v14 }
  0x36   : > { %590 = vmatmul.msk.f32.gmra.mxu0 %vm293_vm0, %v276_v15 }
  0x3c   : > { %602 = vmatmul.msk.f32.gmra.mxu3 %vm293_vm0, %v288_v16  ;;  %596 = vmatmul.msk.f32.gmra.mxu2 %vm293_vm0, %v282_v17 }
  0x3e   : > { %591 = vmatmul.msk.f32.gmra.mxu0 %vm293_vm0, %v277_v18 }
  0x44   : > { %597 = vmatmul.msk.f32.gmra.mxu2 %vm293_vm0, %v283_v19 }
  0x9b   : > { %v359_v24 = vpop.f32.mrf.mxu0 }
  0x9f   : > { %v392_v20 = vpop.f32.mrf.mxu3  ;;  %v374_v21 = vpop.f32.mrf.mxu2 }
  0xa3   : > { %v362_v27 = vpop.f32.mrf.mxu0 }
  0xa7   : > { %v395_v22 = vpop.f32.mrf.mxu3  ;;  %v377_v23 = vpop.f32.mrf.mxu2 }
  0xab   : > { %v365_v30 = vpop.f32.mrf.mxu0 }
  0xaf   : > { %v398_v25 = vpop.f32.mrf.mxu3  ;;  %v380_v26 = vpop.f32.mrf.mxu2 }
  0xb3   : > { %v368_v34 = vpop.f32.mrf.mxu0 }
  0xb7   : > { %v401_v28 = vpop.f32.mrf.mxu3  ;;  %v383_v29 = vpop.f32.mrf.mxu2 }
  0xbb   : > { %v371_v35 = vpop.f32.mrf.mxu0 }
  0xbf   : > { %v404_v31 = vpop.f32.mrf.mxu3  ;;  %v386_v32 = vpop.f32.mrf.mxu2 }
  0xc0   : > { %413 = vmatpush.msra.mxu1 %v404_v31 }
  0xc2   : > { %414 = vmatpush.msra.mxu1 %v401_v28 }
  0xc4   : > { %415 = vmatpush.msra.mxu1 %v398_v25 }
  0xc6   : > { %416 = vmatpush.msra.mxu1 %v395_v22 }
  0xc7   : > { %v389_v33 = vpop.f32.mrf.mxu2 }
  0xc8   : > { %417 = vmatpush.msra.mxu1 %v392_v20 }
  0xca   : > { %418 = vmatpush.msra.mxu1 %v389_v33 }
  0xcc   : > { %419 = vmatpush.msra.mxu1 %v386_v32 }
  0xce   : > { %420 = vmatpush.msra.mxu1 %v383_v29 }
  0xd0   : > { %421 = vmatpush.msra.mxu1 %v380_v26 }
  0xd2   : > { %422 = vmatpush.msra.mxu1 %v377_v23 }
  0xd4   : > { %423 = vmatpush.msra.mxu1 %v374_v21 }
  0xd6   : > { %424 = vmatpush.msra.mxu1 %v371_v35 }
  0xd8   : > { %425 = vmatpush.msra.mxu1 %v368_v34 }
  0xda   : > { %426 = vmatpush.msra.mxu1 %v365_v30 }
  0xdc   : > { %427 = vmatpush.msra.mxu1 %v362_v27 }
  0xde   : > { %428 = vmatpush.msra.mxu1 %v359_v24 }
  0xdf   : > { %429 = vmatmul.f32.vlgmr.msra.gmra.mxu1 %v407_v36 }
  0xe7   : > { %432 = vmatmul.f32.gmra.mxu1 %v408_v37 }
 0x15c   : > { %v430_v39 = vpop.f32.mrf.mxu1 }
 0x15d   : > { %v431_v40 = vadd.f32 %v675_v38, %v430_v39 }
 0x15f   : > { %436 = vst [vmem:[%s253_s12] sm:$0xff] %v431_v40 }
 0x164   : > { %v433_v41 = vpop.f32.mrf.mxu1 }
 0x165   : > { %v434_v42 = vadd.f32 %v675_v38, %v433_v41 }
 0x167   : > { %437 = vst [vmem:[%s253_s12 + $0x8] sm:$0xff] %v434_v42 }
 0x168   : > { %703 = shalt.err (!%p700_p5)
}
 0x169   : > { %s756_s30 = smov 128   ;;  %s757_s7 = smov 8  }
 0x16a   : > { %618 = dma.vmem_to_hbm [thread:$0]  (%p823_p4), %s455_s13, 256, %s457_s14, %s439_s21, %s756_s30, %s756_s30, %s757_s7  }
 0x16b PF: > { %p624_p6 = scmp.ge.s32.totalorder %s754_s20, 2  ;;  %s471_s8 = sand.u32 1, %s734_s15  }
 0x16c   : > { %s472_s9 = scalar_lea.sflag [#allocation3], %s471_s8 }
 0x16d   : > { %p621_p7 = pnand %p624_p6, %p830_p8 }
 0x16f   : > { %p622_p9 = pneg %p621_p7 }
 0x171   : > { %729 = dma.done.wait (%p622_p9), %s472_s9, 256  }
 0x172   : > { %731 = vsyncadd (%p622_p9), %s472_s9, 4294967040  ;;  %s17_s20 = sadd.s32 1, %s754_s20   ;;  %s942_s15 = smov %s738_s16 }
 0x173   : > { %p14_p10 = scmp.ge.s32.totalorder %s17_s20, 4   ;;  %s943_s16 = smov %s742_s17 }
 0x174   : > { %s944_s17 = smov %s836_s28  ;;  %s945_s18 = smov %s750_s19 }
 0x175   : > { %s946_s19 = smov %s948_s23  ;;  %16 = sbr.rel (!%p14_p10) target bundleno = 4 (0x4), region = 80 }
 0x17a   :  { %478 = vsyncpa [#allocation3], 1 }
 0x17b   :  { %480 = vsyncpa [#allocation3 + $0x1], 1 }

</bundles_post_ra>
